<compile_context>
chip_gen: v5e
topology: v5e:2x2
jax: 0.10.0
libtpu: 0.0.40
codegen_flags: <defaults>
</compile_context>

<pallas_src>
import jax
import jax.numpy as jnp
from jax.experimental import pallas as pl
from jax.experimental.pallas import tpu as pltpu


def _round_up(x: int, m: int) -> int:
    return ((x + m - 1) // m) * m


def _patch_embed_kernel(x_ref, w_ref, b_ref, o_ref):
    # x_ref: (tm, K)  bf16 (streamed)      w_ref: (K, E_pad) bf16 (VMEM-resident)
    # b_ref: (1, E_pad) f32 (resident)     o_ref: (tm, E_pad) out_dtype (bf16)
    acc = jnp.dot(x_ref[...], w_ref[...], preferred_element_type=jnp.float32)
    # Keep the bias add in f32 (v5e has no bf16 VALU); cast only at the store.
    o_ref[...] = (acc + b_ref[...]).astype(o_ref.dtype)


def prepare_patch_embed_params(weight, bias, *, compute_dtype=jnp.bfloat16):
    """One-time param prep (keep outside the per-step hot path).

    Conv2d weight (E, C, P, P) / bias (E,) -> matmul operands:
      w_flat : (K, E_pad) compute_dtype   (K = C*P*P, unpadded; E lane-padded to 128)
      b_flat : (1, E_pad) float32
    """
    E, C, P, _ = weight.shape
    K = C * P * P
    E_pad = _round_up(E, 128)
    w_flat = weight.reshape(E, K).T.astype(compute_dtype)          # (K, E), one-time
    w_flat = jnp.pad(w_flat, ((0, 0), (0, E_pad - E)))             # pad E only
    b_flat = jnp.pad(bias.astype(jnp.float32), (0, E_pad - E)).reshape(1, E_pad)
    return w_flat, b_flat


def patch_embedding(x, w_flat, b_flat, patch_size, embed_dim, *,
                    tm_target=1024, compute_dtype=jnp.bfloat16,
                    out_dtype=jnp.bfloat16,
                    vmem_budget_bytes=12 * 1024 * 1024):
    """x: (B, C, H, W); w_flat/b_flat from prepare_patch_embed_params.

    Returns (B, n_patches, embed_dim) in out_dtype, matching
    nn.Conv2d(C, E, P, stride=P)(x).flatten(2).transpose(1, 2).
    """
    B, C, H, W = x.shape
    P = patch_size
    assert H % P == 0 and W % P == 0
    hp, wp = H // P, W // P
    n_patches = hp * wp
    E = embed_dim
    K = C * P * P
    K_w, E_pad = w_flat.shape
    assert K_w == K, "weight was prepared for a different patch/channel config"

    # --- glue (layout only, fused into the input DMA): patchify NCHW -> (M, K) ---
    # (B, C, hp, P, wp, P) -> (B, hp, wp, C, P, P) -> (M, K); the per-patch (C, P, P)
    # feature order matches the OIHW conv-weight flattening in prepare_*.
    patches = x.astype(compute_dtype).reshape(B, C, hp, P, wp, P)
    patches = patches.transpose(0, 2, 4, 1, 3, 5).reshape(B * n_patches, K)

    M = B * n_patches
    in_itemsize = jnp.dtype(compute_dtype).itemsize
    out_itemsize = jnp.dtype(out_dtype).itemsize

    # M tile: multiple of 16 (bf16 vreg holds [16,128]); at least ~4 grid steps so the
    # "parallel" axis can be sharded across v7x's two TensorCores; clamped so
    # double-buffered in/out tiles + single-buffered weight/bias fit the VMEM budget.
    tm = min(tm_target, _round_up(M, 16))
    tm = min(tm, max(16, _round_up(pl.cdiv(M, 4), 16)))
    resident = K * E_pad * in_itemsize + E_pad * 4                    # weight + bias (1 buf each)
    per_row = 2 * K * in_itemsize + 2 * E_pad * out_itemsize          # 2-buf input + 2-buf output
    tm_vmem = max(16, ((vmem_budget_bytes - resident) // per_row) // 16 * 16)
    tm = max(16, min(tm, tm_vmem))

    M_pad = _round_up(M, tm)
    if M_pad != M:
        patches = jnp.pad(patches, ((0, M_pad - M), (0, 0)))  # pad rows only; K never padded in HBM

    grid = (M_pad // tm,)
    cost = pl.CostEstimate(
        flops=2 * M * K * E,
        transcendentals=0,
        bytes_accessed=(M_pad * K + K * E_pad) * in_itemsize
        + E_pad * 4
        + M_pad * E_pad * out_itemsize,
    )

    out = pl.pallas_call(
        _patch_embed_kernel,
        out_shape=jax.ShapeDtypeStruct((M_pad, E_pad), out_dtype),
        grid_spec=pltpu.PrefetchScalarGridSpec(
            num_scalar_prefetch=0,
            grid=grid,
            in_specs=[
                # Streamed patch tiles; last dim == full K bypasses the 128-lane rule.
                pl.BlockSpec((tm, K), lambda i: (i, 0)),
                # Resident weight / bias: constant index_map -> single buffer.
                pl.BlockSpec((K, E_pad), lambda i: (0, 0),
                             pipeline_mode=pl.Buffered(1)),
                pl.BlockSpec((1, E_pad), lambda i: (0, 0),
                             pipeline_mode=pl.Buffered(1)),
            ],
            out_specs=pl.BlockSpec((tm, E_pad), lambda i: (i, 0)),
        ),
        compiler_params=pltpu.CompilerParams(
            dimension_semantics=("parallel",),          # megacore-shard the M axis
            allow_input_fusion=[True, False, False],    # fuse patch rearrange into input DMA
        ),
        cost_estimate=cost,
    )(patches, w_flat, b_flat)

    if M_pad != M or E_pad != E:
        # TODO(synk): downstream layers could consume the E_pad-wide slab directly to
        # avoid this slice copy; bf16 output already halves its cost.
        out = out[:M, :E]
    return out.reshape(B, n_patches, E)


if __name__ == "__main__":
    # Shapes matching the module defaults: img_size=32, patch_size=4,
    # in_channels=3, embed_dim=192, batch=2  ->  M = 2*64 = 128 patches.
    B, C, H, W = 2, 3, 32, 32
    P = 4
    E = 192

    key = jax.random.PRNGKey(0)
    kx, kw, kb = jax.random.split(key, 3)
    x = jax.random.normal(kx, (B, C, H, W), dtype=jnp.float32)
    weight = jax.random.normal(kw, (E, C, P, P), dtype=jnp.float32) * 0.02
    bias = jax.random.normal(kb, (E,), dtype=jnp.float32) * 0.02

    # Weight prep happens once, outside the per-call hot path.
    w_flat, b_flat = prepare_patch_embed_params(weight, bias)

    run = jax.jit(lambda xx, ww, bb: patch_embedding(xx, ww, bb, P, E))
    out = jax.block_until_ready(run(x, w_flat, b_flat))

    # Reference: same semantics as nn.Conv2d(stride=P)(x).flatten(2).transpose(1, 2).
    ref = jax.lax.conv_general_dilated(
        x, weight, window_strides=(P, P), padding="VALID",
        dimension_numbers=("NCHW", "OIHW", "NCHW"),
    ) + bias.reshape(1, E, 1, 1)
    ref = ref.reshape(B, E, -1).transpose(0, 2, 1)

    assert out.shape == (B, (H // P) * (W // P), E)
    assert out.dtype == jnp.bfloat16
    # bf16 inputs/output with f32 MXU accumulation -> compare at bf16-level tolerance.
    err = float(jnp.max(jnp.abs(out.astype(jnp.float32) - ref)))
    assert jnp.allclose(out.astype(jnp.float32), ref, atol=2e-2, rtol=2e-2), err

    print("KERNEL_OK")
</pallas_src>

<mosaic_0001>
module attributes {stable_mosaic.version = 11 : i64} {
  func.func @_patch_embed_kernel(%arg0: i32, %arg1: memref<32x48xbf16, #tpu.memory_space<vmem>>, %arg2: memref<48x256xbf16, #tpu.memory_space<vmem>>, %arg3: memref<1x256xf32, #tpu.memory_space<vmem>>, %arg4: memref<32x256xbf16, #tpu.memory_space<vmem>>) attributes {dimension_semantics = [#tpu.dimension_semantics<parallel>], iteration_bounds = array<i64: 4>, scalar_prefetch = 0 : i64, scratch_operands = 0 : i64, tpu.core_type = #tpu.core_type<tc>, window_params = [{transform_indices = @transform_0, window_bounds = array<i64: 32, 48>}, {pipeline_mode = #tpu.pipeline_mode<synchronous>, transform_indices = @transform_1, window_bounds = array<i64: 48, 256>}, {pipeline_mode = #tpu.pipeline_mode<synchronous>, transform_indices = @transform_2, window_bounds = array<i64: 1, 256>}, {transform_indices = @transform_3, window_bounds = array<i64: 32, 256>}]} {
    %c0 = arith.constant 0 : index
    %c0_0 = arith.constant 0 : index
    %0 = vector.load %arg1[%c0, %c0_0] : memref<32x48xbf16, #tpu.memory_space<vmem>>, vector<32x48xbf16>
    %c0_1 = arith.constant 0 : index
    %c0_2 = arith.constant 0 : index
    %1 = vector.load %arg2[%c0_1, %c0_2] : memref<48x256xbf16, #tpu.memory_space<vmem>>, vector<48x256xbf16>
    %cst = arith.constant dense<0.000000e+00> : vector<32x256xf32>
    %2 = tpu.matmul %0, %1, %cst {dimension_numbers = #tpu.dot_dimension_numbers<[1], [0], [0], [1], [0, 0, 1, 1], [], []>} : vector<32x48xbf16>, vector<48x256xbf16>, vector<32x256xf32> -> vector<32x256xf32>
    %c0_3 = arith.constant 0 : index
    %c0_4 = arith.constant 0 : index
    %3 = vector.load %arg3[%c0_3, %c0_4] : memref<1x256xf32, #tpu.memory_space<vmem>>, vector<1x256xf32>
    %4 = vector.broadcast %3 : vector<1x256xf32> to vector<32x256xf32>
    %5 = arith.addf %2, %4 : vector<32x256xf32>
    %6 = arith.truncf %5 : vector<32x256xf32> to vector<32x256xbf16>
    %c0_5 = arith.constant 0 : index
    %c0_6 = arith.constant 0 : index
    %7 = vector.load %arg4[%c0_5, %c0_6] : memref<32x256xbf16, #tpu.memory_space<vmem>>, vector<32x256xbf16>
    tpu.vector_store %arg4[%c0_5, %c0_6], %6 {strides = array<i32>} : memref<32x256xbf16, #tpu.memory_space<vmem>>, vector<32x256xbf16>,
    return
  }
  func.func @transform_0(%arg0: i32) -> (i32, i32) {
    %c0_i32 = arith.constant 0 : i32
    %c0_i32_0 = arith.constant 0 : i32
    return %arg0, %c0_i32 : i32, i32
  }
  func.func @transform_1(%arg0: i32) -> (i32, i32) {
    %c0_i32 = arith.constant 0 : i32
    %c0_i32_0 = arith.constant 0 : i32
    %c0_i32_1 = arith.constant 0 : i32
    return %c0_i32, %c0_i32_0 : i32, i32
  }
  func.func @transform_2(%arg0: i32) -> (i32, i32) {
    %c0_i32 = arith.constant 0 : i32
    %c0_i32_0 = arith.constant 0 : i32
    %c0_i32_1 = arith.constant 0 : i32
    return %c0_i32, %c0_i32_0 : i32, i32
  }
  func.func @transform_3(%arg0: i32) -> (i32, i32) {
    %c0_i32 = arith.constant 0 : i32
    %c0_i32_0 = arith.constant 0 : i32
    return %arg0, %c0_i32 : i32, i32
  }
}

</mosaic_0001>

<bundles_post_ra>
// kernel: _lambda_.1
= control target key start
LH: loop header
LB: loop body
LE: loop exit
PB: predicated region body
PF: predicated region fallthrough
CT: control target
= control target key end

     0   :  { %8 = vsyncpa [#allocation3], 0  ;;  %s680_s0 = inlined_call_operand.vmem [shape: bf16[128,48], index: 0, kind: input, shape index: {}]   ;;  %s681_s1 = inlined_call_operand.vmem [shape: bf16[48,256], index: 1, kind: input, shape index: {}]   ;;  %s682_s2 = inlined_call_operand.vmem [shape: f32[1,256], index: 2, kind: input, shape index: {}]   ;;  %s683_s3 = inlined_call_operand.hbm [shape: bf16[128,256], index: 3, kind: output, shape index: {}]  }
   0x1   :  { %10 = vsyncpa [#allocation3 + $0x1], 0  ;;  %s553_s12 = smov 0   ;;  %s555_s13 = smov 0  }
   0x2   :  { %s557_s14 = smov 0   ;;  %s559_s15 = smov 0  }
   0x3 LB: > { %s574_s16 = sadd.s32 4294967295, %s529_s15   ;;  %s361_s17 = sadd.s32 4294967294, %s529_s15   ;;  %s529_s15 = sphi %s559_s15, %s689_s15   ;;  %s525_s14 = sphi %s557_s14, %s688_s14   ;;  %s521_s13 = sphi %s555_s13, %s687_s13   ;;  %s517_s12 = sphi %s553_s12, %s686_s12  }
   0x4   : > { %s578_s18 = sadd.s32 1, %s529_s15   ;;  %s91_s19 = sadd.s32 1, %s525_s14 }
   0x5   : > { %s88_s20 = ssub.s32 %s529_s15, %s578_s18  ;;  %p101_p0 = scmp.ne.s32.totalorder %s525_s14, %s521_s13 }
   0x6   : > { %p89_p1 = scmp.eq.s32.totalorder %s88_s20, 0  ;;  %p102_p2 = scmp.eq.s32.totalorder %s574_s16, 3 }
   0x7   : > { %p107_p3 = scmp.ne.s32.totalorder %s521_s13, %s517_s12  ;;  %p108_p4 = scmp.eq.s32.totalorder %s361_s17, 3 }
   0x8   : > { %s589_s21 = scalar_select %p89_p1, %s525_s14, %s91_s19  }
   0x9   : > { %p591_p5 = por %p102_p2, %p101_p0  ;;  %p595_p6 = por %p108_p4, %p107_p3 }
   0xa   : > { %p364_p7 = scmp.ge.s32.totalorder %s529_s15, 1  ;;  %p141_p8 = scmp.lt.s32.totalorder %s529_s15, 5 }
   0xc   : > { %p142_p9 = pnand %p364_p7, %p141_p8 }
   0xd   : > { %s366_s26 = sshll.u32 (!%p142_p9), %s574_s16, 2  ;;  %s162_s10 = sand.u32 (!%p142_p9), 1, %s521_s13  }
   0xe   : > { %145 = sbr.rel (%p142_p9) target bundleno = 182 (0xb6), region = 32  ;;  %p166_p10 = scmp.lt.s32.totalorder (!%p142_p9), %s366_s26, 15 }
   0xf   : > { %s365_s11 = sshll.u32 (!%p142_p9), %s162_s10, 5  ;;  %s419_s19 = sshll.u32 (!%p142_p9), %s574_s16, 5 }
  0x10   : > { %s164_s17 = scalar_lea.vmem (!%p142_p9), [#allocation2], %s365_s11  ;;  %s295_s25 = scalar_lea.hbm (!%p142_p9), %s683_s3, %s419_s19 }
  0x11   : > { %s298_s27 = sshll.u32 (!%p142_p9), %s295_s25, 4  ;;  %s283_s16 = scalar_lea.sflag (!%p142_p9), [#allocation3], %s162_s10  ;;  %s299_s27 = int_to_ptr.hbm [resolvable:$true] %s298_s27 }
  0x12   : > { %s481_s28 = sshra.s32 (!%p142_p9), %s299_s27, 4  ;;  %s487_s5 = scalar_lea.hbm (!%p142_p9), %s683_s3, 128  ;;  %s482_s28 = int_to_ptr.hbm [resolvable:$true] %s481_s28 }
  0x13   : > { %v394_v0 = vld [vmem:[%s681_s1 + $0x20] sm:$0xf]  ;;  %v417_v1 = vld [vmem:[%s681_s1 + $0x24] sm:$0xf0]  ;;  %v416_v2 = vld [vmem:[%s681_s1 + $0x24] sm:$0xf]  ;;  %p488_p0 = scmp.lt.s32.totalorder %s482_s28, %s683_s3 }
  0x14   : > { %v395_v3 = vor.u32 %v417_v1, %v394_v0  ;;  %v396_v4 = vld [vmem:[%s681_s1 + $0x28] sm:$0xf0]  ;;  %v386_v5 = vld [vmem:[%s681_s1 + $0x10] sm:$0xf]  ;;  %v415_v6 = vld [vmem:[%s681_s1 + $0x14] sm:$0xf0] }
  0x15   : > { %v399_v7 = vor.u32 %v416_v2, %v396_v4  ;;  %v414_v8 = vld [vmem:[%s681_s1 + $0x14] sm:$0xf]  ;;  %v388_v9 = vld [vmem:[%s681_s1 + $0x18] sm:$0xf0]  ;;  %v387_v10 = vor.u32 %v415_v6, %v386_v5  ;;  %v378_v12 = vld [vmem:[%s681_s1] sm:$0xf] }
  0x16   : > { %241 = vmatpush.bf16.msra.mxu0 %v395_v3  ;;  %420 = vmatpush.bf16.msra.mxu2 %v395_v3  ;;  %v391_v11 = vor.u32 %v414_v8, %v388_v9  ;;  %v413_v13 = vld [vmem:[%s681_s1 + $0x4] sm:$0xf0]  ;;  %v412_v14 = vld [vmem:[%s681_s1 + $0x4] sm:$0xf]  ;;  %v380_v15 = vld [vmem:[%s681_s1 + $0x8] sm:$0xf0] }
  0x17   : > { %260 = vmatpush.bf16.msra.mxu1 %v399_v7  ;;  %423 = vmatpush.bf16.msra.mxu3 %v399_v7  ;;  %v379_v16 = vor.u32 %v413_v13, %v378_v12  ;;  %s691_s26 = smov (!%p166_p10, %s366_s26), 15  ;;  %v383_v17 = vor.u32 %v412_v14, %v380_v15  ;;  %vm229_vm0 = vcmask 392192   ;;  %v183_v20 = vld [vmem:[%s682_s2] sm:$0x3]  ;;  %s483_s29 = scalar_lea.hbm %s482_s28, 32 }
  0x18   : > { %s367_s4 = sshll.u32 %s691_s26, 2  ;;  %v185_v21 = vperm.slane %v183_v20, 0  ;;  %v186_v22 = vperm.slane %v183_v20, 1  ;;  %s296_s26 = sshll.u32 %s164_s17, 4  ;;  %s297_s26 = int_to_ptr.vmem [resolvable:$true] %s296_s26 }
  0x19   : > { %s169_s7 = scalar_lea.vmem %s680_s0, %s367_s4  ;;  %p484_p11 = scmp.ne.s32.totalorder %s482_s28, %s483_s29 }
  0x1a   : > { %242 = vmatpush.bf16.msra.mxu0 %v387_v10  ;;  %421 = vmatpush.bf16.msra.mxu2 %v387_v10  ;;  %v410_v18 = vld [vmem:[%s169_s7] sm:$0xff]  ;;  %v411_v19 = vld [vmem:[%s169_s7 + $0x8] sm:$0xff]  ;;  %p489_p1 = scmp.lt.s32.totalorder %s487_s5, %s483_s29 }
  0x1b   : > { %261 = vmatpush.bf16.msra.mxu1 %v391_v11  ;;  %424 = vmatpush.bf16.msra.mxu3 %v391_v11  ;;  %p485_p12 = pnand %p484_p11, %p591_p5 }
  0x1c   : > { %p490_p2 = por %p489_p1, %p488_p0 }
  0x1d   : > { %p486_p13 = pneg %p485_p12 }
  0x1e   : > { %243 = vmatpush.bf16.msra.mxu0 %v379_v16  ;;  %422 = vmatpush.bf16.msra.mxu2 %v379_v16 }
  0x1f   : > { %262 = vmatpush.bf16.msra.mxu1 %v383_v17  ;;  %425 = vmatpush.bf16.msra.mxu3 %v383_v17  ;;  %p491_p3 = pnand %p490_p2, %p486_p13 }
  0x21   : > { %400 = vmatmul.msk.bf16.vlgmr.msra.gmra.mxu0 %vm229_vm0, %v410_v18  ;;  %401 = vmatmul.msk.bf16.vlgmr.msra.gmra.mxu2 %vm229_vm0, %v411_v19 }
  0x22   : > { %402 = vmatmul.msk.bf16.vlgmr.msra.gmra.mxu1 %vm229_vm0, %v410_v18  ;;  %403 = vmatmul.msk.bf16.vlgmr.msra.gmra.mxu3 %vm229_vm0, %v411_v19 }
  0x9e   : > { %v245_v23 = vpop.f32.mrf.mxu0 }
  0x9f   : > { %v246_v24 = vadd.f32 %v245_v23, %v185_v21  ;;  %v264_v25 = vpop.f32.mrf.mxu1 }
  0xa0   : > { %v265_v26 = vadd.f32 %v264_v25, %v186_v22 }
  0xa2   : > { %v274_v27 = vpack.c.bf16 %v265_v26, %v246_v24 }
  0xa4   : > { %278 = vst [vmem:[%s164_s17] sm:$0xff] %v274_v27  ;;  %v250_v28 = vpop.f32.mrf.mxu2 }
  0xa5   : > { %v251_v29 = vadd.f32 %v250_v28, %v185_v21  ;;  %v269_v30 = vpop.f32.mrf.mxu3 }
  0xa6   : > { %v270_v31 = vadd.f32 %v269_v30, %v186_v22  ;;  %v247_v32 = vpop.f32.mrf.mxu0 }
  0xa7   : > { %v248_v33 = vadd.f32 %v247_v32, %v185_v21  ;;  %v266_v34 = vpop.f32.mrf.mxu1 }
  0xa8   : > { %v276_v35 = vpack.c.bf16 %v270_v31, %v251_v29  ;;  %v267_v36 = vadd.f32 %v266_v34, %v186_v22 }
  0xaa   : > { %280 = vst [vmem:[%s164_s17 + $0x10] sm:$0xff] %v276_v35  ;;  %v275_v37 = vpack.c.bf16 %v267_v36, %v248_v33 }
  0xac   : > { %279 = vst [vmem:[%s164_s17 + $0x8] sm:$0xff] %v275_v37  ;;  %v252_v38 = vpop.f32.mrf.mxu2 }
  0xad   : > { %v253_v39 = vadd.f32 %v252_v38, %v185_v21  ;;  %v271_v40 = vpop.f32.mrf.mxu3 }
  0xae   : > { %v272_v41 = vadd.f32 %v271_v40, %v186_v22 }
  0xb0   : > { %v277_v42 = vpack.c.bf16 %v272_v41, %v253_v39 }
  0xb2   : > { %281 = vst [vmem:[%s164_s17 + $0x18] sm:$0xff] %v277_v42 }
  0xb3   : > { %494 = shalt.err (!%p491_p3)
}
  0xb4   : > { %s531_s8 = smov 128   ;;  %s532_s9 = smov 8  }
  0xb5   : > { %426 = dma.vmem_to_hbm [thread:$0]  (%p591_p5), %s297_s26, 512, %s299_s27, %s283_s16, %s531_s8, %s531_s8, %s532_s9  }
  0xb6 PF: > { %p432_p4 = scmp.ge.s32.totalorder %s529_s15, 2  ;;  %s313_s10 = sand.u32 1, %s517_s12  }
  0xb7   : > { %s314_s11 = scalar_lea.sflag [#allocation3], %s313_s10 }
  0xb8   : > { %p429_p7 = pnand %p432_p4, %p595_p6 }
  0xba   : > { %p430_p8 = pneg %p429_p7 }
  0xbc   : > { %512 = dma.done.wait (%p430_p8), %s314_s11, 512  }
  0xbd   : > { %514 = vsyncadd (%p430_p8), %s314_s11, 4294966784  ;;  %p13_p9 = scmp.ge.s32.totalorder %s578_s18, 6   ;;  %s686_s12 = smov %s521_s13 }
  0xbe   : > { %s687_s13 = smov %s525_s14  ;;  %s688_s14 = smov %s589_s21 }
  0xbf   : > { %s689_s15 = smov %s578_s18  ;;  %15 = sbr.rel (!%p13_p9) target bundleno = 3 (0x3), region = 67 }
  0xc4   :  { %320 = vsyncpa [#allocation3], 1 }
  0xc5   :  { %322 = vsyncpa [#allocation3 + $0x1], 1 }

</bundles_post_ra>
